<compile_context>
chip_gen: v5e
topology: v5e:2x2
jax: 0.10.0
libtpu: 0.0.40
codegen_flags: <defaults>
</compile_context>

<pallas_src>
import functools

import jax
import jax.numpy as jnp
from jax.experimental import pallas as pl
from jax.experimental.pallas import tpu as pltpu

LANE = 128


def _round_up(n, m):
    return ((n + m - 1) // m) * m


def _cdiv(a, b):
    return (a + b - 1) // b


def dqn_kernel(x_ref, w1_ref, b1_ref, w2_ref, b2_ref,
               w3_ref, b3_ref, w4_ref, b4_ref, o_ref, *, out_size):
    # Weights are bf16, pre-transposed to (in, out) and zero-padded to 128 lanes.
    # Biases are f32 (1, out_padded). Accumulation is f32 on the MXU.
    h = jnp.dot(x_ref[...].astype(jnp.bfloat16), w1_ref[...],
                preferred_element_type=jnp.float32)
    h = jnp.maximum(h + b1_ref[...], 0.0)

    h = jnp.dot(h.astype(jnp.bfloat16), w2_ref[...],
                preferred_element_type=jnp.float32)
    h = jnp.maximum(h + b2_ref[...], 0.0)

    h = jnp.dot(h.astype(jnp.bfloat16), w3_ref[...],
                preferred_element_type=jnp.float32)
    h = jnp.maximum(h + b3_ref[...], 0.0)

    # The PyTorch forward applies ReLU to the output layer as well.
    h = jnp.dot(h.astype(jnp.bfloat16), w4_ref[...],
                preferred_element_type=jnp.float32)
    # Store only the real out_size columns; HBM output is (bp, out_size), not
    # the 128-lane padded slab (masked vst into the VMEM tile is per-tile noise
    # compared to the saved writeback DMA).
    o_ref[...] = jnp.maximum(h + b4_ref[...], 0.0)[:, :out_size]


def dqn_forward(x, kparams, *, out_size, block_rows=1024):
    """x: (B, input_size) f32 (bf16 also accepted if the producer emits it).
    kparams: padded/bf16 params from prepare_kernel_params."""
    B, in_size = x.shape

    # Adaptive batch tile: big tiles amortize the ~0.35us/grid-step overhead,
    # tb = round_up(cdiv(B, n_tiles), 8) keeps batch padding to <= 7 rows.
    n_tiles = _cdiv(B, block_rows)
    # v7x has 2 TensorCores: keep at least 2 parallel tiles once the batch is
    # big enough to be worth splitting (no-op cost on single-TC v5e/v6e).
    if B >= 512 and n_tiles < 2:
        n_tiles = 2
    tb = _round_up(_cdiv(B, n_tiles), 8)
    bp = _round_up(B, tb)
    if bp != B:
        x = jnp.pad(x, ((0, bp - B), (0, 0)))

    grid = (bp // tb,)

    def const_map(i):                       # weights: resident across grid steps
        return (0, 0)

    param_order = ("w1", "b1", "w2", "b2", "w3", "b3", "w4", "b4")
    # Constant index_map + single buffer: no re-DMA and no double-buffer VMEM.
    weight_specs = [
        pl.BlockSpec(kparams[k].shape, const_map,
                     pipeline_mode=pl.Buffered(buffer_count=1))
        for k in param_order
    ]

    layer_dims = [kparams[f"w{i}"].shape for i in (1, 2, 3, 4)]
    flops = 2 * bp * sum(a * b for a, b in layer_dims)
    bytes_accessed = (bp * in_size * x.dtype.itemsize
                      + sum(kparams[k].size * kparams[k].dtype.itemsize
                            for k in param_order)
                      + bp * out_size * 4)

    out = pl.pallas_call(
        functools.partial(dqn_kernel, out_size=out_size),
        out_shape=jax.ShapeDtypeStruct((bp, out_size), jnp.float32),
        grid=grid,
        in_specs=[pl.BlockSpec((tb, in_size), lambda i: (i, 0))] + weight_specs,
        out_specs=pl.BlockSpec((tb, out_size), lambda i: (i, 0)),
        compiler_params=pltpu.CompilerParams(
            dimension_semantics=("parallel",),
            vmem_limit_bytes=32 * 1024 * 1024),
        cost_estimate=pl.CostEstimate(
            flops=flops, transcendentals=0, bytes_accessed=bytes_accessed),
    )(x, *(kparams[k] for k in param_order))

    return out[:B]


def init_params(key, input_size, output_size):
    """PyTorch-style uniform(-1/sqrt(fan_in), 1/sqrt(fan_in)) init.
    Weights stored transposed: (in_features, out_features). Master copy in f32."""
    dims = [(input_size, 80), (80, 100), (100, 75), (75, output_size)]
    params = {}
    keys = jax.random.split(key, 2 * len(dims))
    for i, (fan_in, fan_out) in enumerate(dims):
        bound = 1.0 / (fan_in ** 0.5)
        w = jax.random.uniform(keys[2 * i], (fan_in, fan_out),
                               minval=-bound, maxval=bound, dtype=jnp.float32)
        b = jax.random.uniform(keys[2 * i + 1], (1, fan_out),
                               minval=-bound, maxval=bound, dtype=jnp.float32)
        params[f"w{i + 1}"] = w
        params[f"b{i + 1}"] = b
    return params


def prepare_kernel_params(params):
    """Zero-pad every out-feature dim (and in-feature dims of layers 2..4) to a
    multiple of 128 lanes and cast weights to bf16. Biases stay f32."""
    kp = {}
    for i in (1, 2, 3, 4):
        w = params[f"w{i}"]
        b = params[f"b{i}"]
        fan_in, fan_out = w.shape
        in_pad = fan_in if i == 1 else _round_up(fan_in, LANE)
        out_pad = _round_up(fan_out, LANE)
        wp = jnp.zeros((in_pad, out_pad), jnp.float32).at[:fan_in, :fan_out].set(w)
        bp = jnp.zeros((1, out_pad), jnp.float32).at[:, :fan_out].set(b)
        kp[f"w{i}"] = wp.astype(jnp.bfloat16)
        kp[f"b{i}"] = bp
    return kp


def dqn_ref(x, p):
    """Pure f32 reference (mirrors the PyTorch module)."""
    h = jnp.maximum(x @ p["w1"] + p["b1"], 0.0)
    h = jnp.maximum(h @ p["w2"] + p["b2"], 0.0)
    h = jnp.maximum(h @ p["w3"] + p["b3"], 0.0)
    return jnp.maximum(h @ p["w4"] + p["b4"], 0.0)


def dqn_ref_bf16(x, kp, out_size):
    """Reference with the same bf16-input / f32-accumulate arithmetic as the kernel."""
    h = x
    for i in (1, 2, 3, 4):
        h = jnp.dot(h.astype(jnp.bfloat16), kp[f"w{i}"],
                    preferred_element_type=jnp.float32)
        h = jnp.maximum(h + kp[f"b{i}"], 0.0)
    return h[:, :out_size]


if __name__ == "__main__":
    input_size = 16
    output_size = 4

    key = jax.random.PRNGKey(0)
    pkey, xkey, xkey2 = jax.random.split(key, 3)
    params = init_params(pkey, input_size, output_size)
    kparams = prepare_kernel_params(params)

    # Small batch (module-scale example): check against both references.
    batch = 2
    x = jax.random.normal(xkey, (batch, input_size), dtype=jnp.float32)
    out = jax.block_until_ready(dqn_forward(x, kparams, out_size=output_size))
    assert out.shape == (batch, output_size)
    ref_bf16 = dqn_ref_bf16(x, kparams, output_size)
    assert jnp.allclose(out, ref_bf16, atol=2e-3, rtol=2e-3)
    ref_f32 = dqn_ref(x, params)
    assert jnp.allclose(out, ref_f32, atol=3e-2, rtol=3e-2)

    # Larger batch: exercises multi-tile grid (>= 2 tiles) + batch padding path.
    batch_big = 600
    xb = jax.random.normal(xkey2, (batch_big, input_size), dtype=jnp.float32)
    out_big = jax.block_until_ready(dqn_forward(xb, kparams, out_size=output_size))
    assert out_big.shape == (batch_big, output_size)
    assert jnp.allclose(out_big, dqn_ref_bf16(xb, kparams, output_size),
                        atol=2e-3, rtol=2e-3)

    print("KERNEL_OK")
</pallas_src>

<mosaic_0001>
module attributes {stable_mosaic.version = 11 : i64} {
  func.func @dqn_kernel(%arg0: i32, %arg1: memref<8x16xf32, #tpu.memory_space<vmem>>, %arg2: memref<16x128xbf16, #tpu.memory_space<vmem>>, %arg3: memref<1x128xf32, #tpu.memory_space<vmem>>, %arg4: memref<128x128xbf16, #tpu.memory_space<vmem>>, %arg5: memref<1x128xf32, #tpu.memory_space<vmem>>, %arg6: memref<128x128xbf16, #tpu.memory_space<vmem>>, %arg7: memref<1x128xf32, #tpu.memory_space<vmem>>, %arg8: memref<128x128xbf16, #tpu.memory_space<vmem>>, %arg9: memref<1x128xf32, #tpu.memory_space<vmem>>, %arg10: memref<8x4xf32, #tpu.memory_space<vmem>>) attributes {dimension_semantics = [#tpu.dimension_semantics<parallel>], iteration_bounds = array<i64: 1>, scalar_prefetch = 0 : i64, scratch_operands = 0 : i64, tpu.core_type = #tpu.core_type<tc>, window_params = [{transform_indices = @transform_0, window_bounds = array<i64: 8, 16>}, {pipeline_mode = #tpu.pipeline_mode<synchronous>, transform_indices = @transform_1, window_bounds = array<i64: 16, 128>}, {pipeline_mode = #tpu.pipeline_mode<synchronous>, transform_indices = @transform_2, window_bounds = array<i64: 1, 128>}, {pipeline_mode = #tpu.pipeline_mode<synchronous>, transform_indices = @transform_3, window_bounds = array<i64: 128, 128>}, {pipeline_mode = #tpu.pipeline_mode<synchronous>, transform_indices = @transform_4, window_bounds = array<i64: 1, 128>}, {pipeline_mode = #tpu.pipeline_mode<synchronous>, transform_indices = @transform_5, window_bounds = array<i64: 128, 128>}, {pipeline_mode = #tpu.pipeline_mode<synchronous>, transform_indices = @transform_6, window_bounds = array<i64: 1, 128>}, {pipeline_mode = #tpu.pipeline_mode<synchronous>, transform_indices = @transform_7, window_bounds = array<i64: 128, 128>}, {pipeline_mode = #tpu.pipeline_mode<synchronous>, transform_indices = @transform_8, window_bounds = array<i64: 1, 128>}, {transform_indices = @transform_9, window_bounds = array<i64: 8, 4>}]} {
    %c0 = arith.constant 0 : index
    %c0_0 = arith.constant 0 : index
    %0 = vector.load %arg1[%c0, %c0_0] : memref<8x16xf32, #tpu.memory_space<vmem>>, vector<8x16xf32>
    %1 = arith.truncf %0 : vector<8x16xf32> to vector<8x16xbf16>
    %c0_1 = arith.constant 0 : index
    %c0_2 = arith.constant 0 : index
    %2 = vector.load %arg2[%c0_1, %c0_2] : memref<16x128xbf16, #tpu.memory_space<vmem>>, vector<16x128xbf16>
    %cst = arith.constant dense<0.000000e+00> : vector<8x128xf32>
    %3 = tpu.matmul %1, %2, %cst {dimension_numbers = #tpu.dot_dimension_numbers<[1], [0], [0], [1], [0, 0, 1, 1], [], []>} : vector<8x16xbf16>, vector<16x128xbf16>, vector<8x128xf32> -> vector<8x128xf32>
    %c0_3 = arith.constant 0 : index
    %c0_4 = arith.constant 0 : index
    %4 = vector.load %arg3[%c0_3, %c0_4] : memref<1x128xf32, #tpu.memory_space<vmem>>, vector<1x128xf32>
    %5 = vector.broadcast %4 : vector<1x128xf32> to vector<8x128xf32>
    %6 = arith.addf %3, %5 : vector<8x128xf32>
    %cst_5 = arith.constant 0.000000e+00 : f32
    %7 = vector.broadcast %cst_5 : f32 to vector<8x128xf32>
    %8 = arith.maximumf %6, %7 : vector<8x128xf32>
    %9 = arith.truncf %8 : vector<8x128xf32> to vector<8x128xbf16>
    %c0_6 = arith.constant 0 : index
    %c0_7 = arith.constant 0 : index
    %10 = vector.load %arg4[%c0_6, %c0_7] : memref<128x128xbf16, #tpu.memory_space<vmem>>, vector<128x128xbf16>
    %cst_8 = arith.constant dense<0.000000e+00> : vector<8x128xf32>
    %11 = tpu.matmul %9, %10, %cst_8 {dimension_numbers = #tpu.dot_dimension_numbers<[1], [0], [0], [1], [0, 0, 1, 1], [], []>} : vector<8x128xbf16>, vector<128x128xbf16>, vector<8x128xf32> -> vector<8x128xf32>
    %c0_9 = arith.constant 0 : index
    %c0_10 = arith.constant 0 : index
    %12 = vector.load %arg5[%c0_9, %c0_10] : memref<1x128xf32, #tpu.memory_space<vmem>>, vector<1x128xf32>
    %13 = vector.broadcast %12 : vector<1x128xf32> to vector<8x128xf32>
    %14 = arith.addf %11, %13 : vector<8x128xf32>
    %cst_11 = arith.constant 0.000000e+00 : f32
    %15 = vector.broadcast %cst_11 : f32 to vector<8x128xf32>
    %16 = arith.maximumf %14, %15 : vector<8x128xf32>
    %17 = arith.truncf %16 : vector<8x128xf32> to vector<8x128xbf16>
    %c0_12 = arith.constant 0 : index
    %c0_13 = arith.constant 0 : index
    %18 = vector.load %arg6[%c0_12, %c0_13] : memref<128x128xbf16, #tpu.memory_space<vmem>>, vector<128x128xbf16>
    %cst_14 = arith.constant dense<0.000000e+00> : vector<8x128xf32>
    %19 = tpu.matmul %17, %18, %cst_14 {dimension_numbers = #tpu.dot_dimension_numbers<[1], [0], [0], [1], [0, 0, 1, 1], [], []>} : vector<8x128xbf16>, vector<128x128xbf16>, vector<8x128xf32> -> vector<8x128xf32>
    %c0_15 = arith.constant 0 : index
    %c0_16 = arith.constant 0 : index
    %20 = vector.load %arg7[%c0_15, %c0_16] : memref<1x128xf32, #tpu.memory_space<vmem>>, vector<1x128xf32>
    %21 = vector.broadcast %20 : vector<1x128xf32> to vector<8x128xf32>
    %22 = arith.addf %19, %21 : vector<8x128xf32>
    %cst_17 = arith.constant 0.000000e+00 : f32
    %23 = vector.broadcast %cst_17 : f32 to vector<8x128xf32>
    %24 = arith.maximumf %22, %23 : vector<8x128xf32>
    %25 = arith.truncf %24 : vector<8x128xf32> to vector<8x128xbf16>
    %c0_18 = arith.constant 0 : index
    %c0_19 = arith.constant 0 : index
    %26 = vector.load %arg8[%c0_18, %c0_19] : memref<128x128xbf16, #tpu.memory_space<vmem>>, vector<128x128xbf16>
    %cst_20 = arith.constant dense<0.000000e+00> : vector<8x128xf32>
    %27 = tpu.matmul %25, %26, %cst_20 {dimension_numbers = #tpu.dot_dimension_numbers<[1], [0], [0], [1], [0, 0, 1, 1], [], []>} : vector<8x128xbf16>, vector<128x128xbf16>, vector<8x128xf32> -> vector<8x128xf32>
    %c0_21 = arith.constant 0 : index
    %c0_22 = arith.constant 0 : index
    %28 = vector.load %arg9[%c0_21, %c0_22] : memref<1x128xf32, #tpu.memory_space<vmem>>, vector<1x128xf32>
    %29 = vector.broadcast %28 : vector<1x128xf32> to vector<8x128xf32>
    %30 = arith.addf %27, %29 : vector<8x128xf32>
    %cst_23 = arith.constant 0.000000e+00 : f32
    %31 = vector.broadcast %cst_23 : f32 to vector<8x128xf32>
    %32 = arith.maximumf %30, %31 : vector<8x128xf32>
    %33 = vector.extract_strided_slice %32 {offsets = [0, 0], sizes = [8, 4], strides = [1, 1]} : vector<8x128xf32> to vector<8x4xf32>
    %c0_24 = arith.constant 0 : index
    %c0_25 = arith.constant 0 : index
    %34 = vector.load %arg10[%c0_24, %c0_25] : memref<8x4xf32, #tpu.memory_space<vmem>>, vector<8x4xf32>
    tpu.vector_store %arg10[%c0_24, %c0_25], %33 {strides = array<i32>} : memref<8x4xf32, #tpu.memory_space<vmem>>, vector<8x4xf32>,
    return
  }
  func.func @transform_0(%arg0: i32) -> (i32, i32) {
    %c0_i32 = arith.constant 0 : i32
    %c0_i32_0 = arith.constant 0 : i32
    return %arg0, %c0_i32 : i32, i32
  }
  func.func @transform_1(%arg0: i32) -> (i32, i32) {
    %c0_i32 = arith.constant 0 : i32
    %c0_i32_0 = arith.constant 0 : i32
    %c0_i32_1 = arith.constant 0 : i32
    return %c0_i32, %c0_i32_0 : i32, i32
  }
  func.func @transform_2(%arg0: i32) -> (i32, i32) {
    %c0_i32 = arith.constant 0 : i32
    %c0_i32_0 = arith.constant 0 : i32
    %c0_i32_1 = arith.constant 0 : i32
    return %c0_i32, %c0_i32_0 : i32, i32
  }
  func.func @transform_3(%arg0: i32) -> (i32, i32) {
    %c0_i32 = arith.constant 0 : i32
    %c0_i32_0 = arith.constant 0 : i32
    %c0_i32_1 = arith.constant 0 : i32
    return %c0_i32, %c0_i32_0 : i32, i32
  }
  func.func @transform_4(%arg0: i32) -> (i32, i32) {
    %c0_i32 = arith.constant 0 : i32
    %c0_i32_0 = arith.constant 0 : i32
    %c0_i32_1 = arith.constant 0 : i32
    return %c0_i32, %c0_i32_0 : i32, i32
  }
  func.func @transform_5(%arg0: i32) -> (i32, i32) {
    %c0_i32 = arith.constant 0 : i32
    %c0_i32_0 = arith.constant 0 : i32
    %c0_i32_1 = arith.constant 0 : i32
    return %c0_i32, %c0_i32_0 : i32, i32
  }
  func.func @transform_6(%arg0: i32) -> (i32, i32) {
    %c0_i32 = arith.constant 0 : i32
    %c0_i32_0 = arith.constant 0 : i32
    %c0_i32_1 = arith.constant 0 : i32
    return %c0_i32, %c0_i32_0 : i32, i32
  }
  func.func @transform_7(%arg0: i32) -> (i32, i32) {
    %c0_i32 = arith.constant 0 : i32
    %c0_i32_0 = arith.constant 0 : i32
    %c0_i32_1 = arith.constant 0 : i32
    return %c0_i32, %c0_i32_0 : i32, i32
  }
  func.func @transform_8(%arg0: i32) -> (i32, i32) {
    %c0_i32 = arith.constant 0 : i32
    %c0_i32_0 = arith.constant 0 : i32
    %c0_i32_1 = arith.constant 0 : i32
    return %c0_i32, %c0_i32_0 : i32, i32
  }
  func.func @transform_9(%arg0: i32) -> (i32, i32) {
    %c0_i32 = arith.constant 0 : i32
    %c0_i32_0 = arith.constant 0 : i32
    return %arg0, %c0_i32 : i32, i32
  }
}

</mosaic_0001>

<bundles_post_ra>
// kernel: tpu_custom_call.1
= control target key start
LH: loop header
LB: loop body
LE: loop exit
PB: predicated region body
PF: predicated region fallthrough
CT: control target
= control target key end

     0   :  { %14 = vsyncpa [#allocation3], 0  ;;  %s749_s0 = inlined_call_operand.hbm [shape: f32[8,16], index: 0, kind: input, shape index: {}]   ;;  %s750_s1 = inlined_call_operand.hbm [shape: bf16[16,128], index: 1, kind: input, shape index: {}]   ;;  %s751_s2 = inlined_call_operand.vmem [shape: f32[1,128], index: 2, kind: input, shape index: {}]   ;;  %s752_s3 = inlined_call_operand.hbm [shape: bf16[128,128], index: 3, kind: input, shape index: {}]   ;;  %s753_s4 = inlined_call_operand.vmem [shape: f32[1,128], index: 4, kind: input, shape index: {}]   ;;  %s754_s5 = inlined_call_operand.hbm [shape: bf16[128,128], index: 5, kind: input, shape index: {}]   ;;  %s755_s6 = inlined_call_operand.vmem [shape: f32[1,128], index: 6, kind: input, shape index: {}]   ;;  %s756_s7 = inlined_call_operand.hbm [shape: bf16[128,128], index: 7, kind: input, shape index: {}]   ;;  %s757_s8 = inlined_call_operand.vmem [shape: f32[1,128], index: 8, kind: input, shape index: {}]   ;;  %s758_s9 = inlined_call_operand.vmem [shape: f32[8,4], index: 9, kind: output, shape index: {}]  }
   0x1   :  { %15 = vsyncpa [#allocation5], 0  ;;  %s32_s11 = sshll.u32 %s750_s1, 4  ;;  %s33_s11 = int_to_ptr.hbm [resolvable:$true] %s32_s11 }
   0x2   :  { %16 = vsyncpa [#allocation8], 0  ;;  %s662_s12 = smov [#allocation4]   ;;  %s62_s16 = sshll.u32 %s754_s5, 4  ;;  %s63_s16 = int_to_ptr.hbm [resolvable:$true] %s62_s16 }
   0x3   :  { %s34_s13 = sshll.u32 %s662_s12, 4  ;;  %s663_s17 = smov 64   ;;  %s35_s13 = int_to_ptr.vmem [resolvable:$true] %s34_s13 }
   0x4   :  { %s664_s18 = smov 4   ;;  %s665_s19 = smov [#allocation7]  }
   0x5   :  { %40 = dma.hbm_to_vmem [thread:$0]  %s33_s11, 128, %s35_s13, [#allocation5], %s663_s17, %s663_s17, %s664_s18  }
   0x6   :  { %s64_s20 = sshll.u32 %s665_s19, 4  ;;  %s22_s23 = sshll.u32 %s749_s0, 4  ;;  %s65_s20 = int_to_ptr.vmem [resolvable:$true] %s64_s20  ;;  %s23_s23 = int_to_ptr.hbm [resolvable:$true] %s22_s23 }
   0x7   :  { %70 = dma.hbm_to_vmem [thread:$0]  %s63_s16, 1024, %s65_s20, [#allocation8], %s663_s17, %s663_s17, %s664_s18  }
   0x8   :  { %s47_s25 = sshll.u32 %s752_s3, 4  ;;  %s666_s26 = smov [#allocation2]   ;;  %s48_s25 = int_to_ptr.hbm [resolvable:$true] %s47_s25 }
   0x9   :  { %s24_s27 = sshll.u32 %s666_s26, 4  ;;  %s667_s5 = smov [#allocation6]   ;;  %s25_s27 = int_to_ptr.vmem [resolvable:$true] %s24_s27 }
   0xa   :  { %27 = dma.hbm_to_vmem [thread:$0]  %s23_s23, 128, %s25_s27, [#allocation3]  }
   0xb   :  { %s49_s28 = sshll.u32 %s667_s5, 4  ;;  %s77_s10 = sshll.u32 %s756_s7, 4  ;;  %s50_s28 = int_to_ptr.vmem [resolvable:$true] %s49_s28  ;;  %s78_s10 = int_to_ptr.hbm [resolvable:$true] %s77_s10 }
   0xc   :  { %55 = dma.hbm_to_vmem [thread:$0]  %s48_s25, 1024, %s50_s28, [#allocation5], %s663_s17, %s663_s17, %s664_s18  }
   0xd   :  { %s668_s0 = smov [#allocation9]  }
   0xe   :  { %s79_s11 = sshll.u32 %s668_s0, 4  ;;  %s80_s11 = int_to_ptr.vmem [resolvable:$true] %s79_s11 }
   0xf   :  { %85 = dma.hbm_to_vmem [thread:$0]  %s78_s10, 1024, %s80_s11, [#allocation8], %s663_s17, %s663_s17, %s664_s18  }
  0x10   :  { %656 = dma.done.wait [#allocation3], 128  }
  0x11   :  { %657 = vsyncadd [#allocation3], 4294967168 }
  0x12   :  { %658 = dma.done.wait [#allocation5], 1152  }
  0x13   :  { %659 = vsyncadd [#allocation5], 4294966144 }
  0x14   :  { %660 = dma.done.wait [#allocation8], 2048  }
  0x15   :  { %661 = vsyncadd [#allocation8], 4294965248  ;;  %v500_v0 = vld [vmem:[#allocation4] sm:$0xff]  ;;  %v109_v1 = vld [vmem:[#allocation2] sm:$0xff]  ;;  %vm123_vm0 = vcmask 130048   ;;  %vm390_vm1 = vcmask 31744  }
  0x16   :  { %v508_v2 = vld [vmem:[#allocation6 + $0x38] sm:$0xff]  ;;  %v110_v3 = vpack.c.bf16 %v109_v1, %v109_v1  ;;  %134 = vmatpush.bf16.msra.mxu0 %v500_v0  ;;  %v507_v4 = vld [vmem:[#allocation6 + $0x30] sm:$0xff]  ;;  %v506_v5 = vld [vmem:[#allocation6 + $0x28] sm:$0xff] }
  0x17   :  { %210 = vmatpush.bf16.msra.mxu1 %v508_v2  ;;  %v505_v6 = vld [vmem:[#allocation6 + $0x20] sm:$0xff]  ;;  %v504_v7 = vld [vmem:[#allocation6 + $0x18] sm:$0xff]  ;;  %v503_v8 = vld [vmem:[#allocation6 + $0x10] sm:$0xff] }
  0x18   :  { %v502_v9 = vld [vmem:[#allocation6 + $0x8] sm:$0xff]  ;;  %v501_v10 = vld [vmem:[#allocation6] sm:$0xff]  ;;  %v516_v11 = vld [vmem:[#allocation7 + $0x38] sm:$0xff] }
  0x19   :  { %403 = vmatmul.msk.bf16.vlgmr.msra.gmra.mxu0 %vm123_vm0, %v110_v3  ;;  %293 = vmatpush.bf16.msra.mxu2 %v516_v11  ;;  %v515_v12 = vld [vmem:[#allocation7 + $0x30] sm:$0xff]  ;;  %v514_v13 = vld [vmem:[#allocation7 + $0x28] sm:$0xff]  ;;  %v513_v14 = vld [vmem:[#allocation7 + $0x20] sm:$0xff] }
  0x1a   :  { %v512_v15 = vld [vmem:[#allocation7 + $0x18] sm:$0xff]  ;;  %v511_v16 = vld [vmem:[#allocation7 + $0x10] sm:$0xff]  ;;  %v510_v23 = vld [vmem:[#allocation7 + $0x8] sm:$0xff] }
  0x1b   :  { %211 = vmatpush.bf16.msra.mxu1 %v507_v4  ;;  %v532_v17 = vld [vmem:[%s751_s2] ss:$0 sm:$0xff]  ;;  %v509_v24 = vld [vmem:[#allocation7] sm:$0xff]  ;;  %v524_v25 = vld [vmem:[#allocation9 + $0x38] sm:$0xff] }
  0x1c   :  { %376 = vmatpush.bf16.msra.mxu3 %v524_v25  ;;  %v523_v26 = vld [vmem:[#allocation9 + $0x30] sm:$0xff]  ;;  %v522_v27 = vld [vmem:[#allocation9 + $0x28] sm:$0xff]  ;;  %v521_v28 = vld [vmem:[#allocation9 + $0x20] sm:$0xff] }
  0x1d   :  { %294 = vmatpush.bf16.msra.mxu2 %v515_v12  ;;  %v520_v29 = vld [vmem:[#allocation9 + $0x18] sm:$0xff]  ;;  %v519_v30 = vld [vmem:[#allocation9 + $0x10] sm:$0xff]  ;;  %v518_v37 = vld [vmem:[#allocation9 + $0x8] sm:$0xff] }
  0x1e   :  { %v533_v31 = vld [vmem:[%s753_s4] ss:$0 sm:$0xff]  ;;  %v517_v38 = vld [vmem:[#allocation9] sm:$0xff] }
  0x1f   :  { %212 = vmatpush.bf16.msra.mxu1 %v506_v5  ;;  %v534_v39 = vld [vmem:[%s755_s6] ss:$0 sm:$0xff] }
  0x20   :  { %377 = vmatpush.bf16.msra.mxu3 %v523_v26  ;;  %v535_v45 = vld [vmem:[%s757_s8] ss:$0 sm:$0xff] }
  0x21   :  { %295 = vmatpush.bf16.msra.mxu2 %v514_v13 }
  0x23   :  { %213 = vmatpush.bf16.msra.mxu1 %v505_v6 }
  0x24   :  { %378 = vmatpush.bf16.msra.mxu3 %v522_v27 }
  0x25   :  { %296 = vmatpush.bf16.msra.mxu2 %v513_v14 }
  0x27   :  { %214 = vmatpush.bf16.msra.mxu1 %v504_v7 }
  0x28   :  { %379 = vmatpush.bf16.msra.mxu3 %v521_v28 }
  0x29   :  { %297 = vmatpush.bf16.msra.mxu2 %v512_v15 }
  0x2b   :  { %215 = vmatpush.bf16.msra.mxu1 %v503_v8 }
  0x2c   :  { %380 = vmatpush.bf16.msra.mxu3 %v520_v29 }
  0x2d   :  { %298 = vmatpush.bf16.msra.mxu2 %v511_v16 }
  0x2f   :  { %216 = vmatpush.bf16.msra.mxu1 %v502_v9 }
  0x30   :  { %381 = vmatpush.bf16.msra.mxu3 %v519_v30 }
  0x31   :  { %299 = vmatpush.bf16.msra.mxu2 %v510_v23 }
  0x33   :  { %217 = vmatpush.bf16.msra.mxu1 %v501_v10 }
  0x34   :  { %382 = vmatpush.bf16.msra.mxu3 %v518_v37 }
  0x35   :  { %300 = vmatpush.bf16.msra.mxu2 %v509_v24 }
  0x38   :  { %383 = vmatpush.bf16.msra.mxu3 %v517_v38 }
  0x96   :  { %v136_v18 = vpop.f32.mrf.mxu0 }
  0x97   :  { %v137_v19 = vadd.f32 %v532_v17, %v136_v18 }
  0x99   :  { %v140_v20 = vmax.f32 %v137_v19, 0.0 }
  0x9b   :  { %v141_v21 = vpack.c.bf16 %v140_v20, %v140_v20 }
  0x9d   :  { %218 = vmatmul.bf16.vlgmr.msra.gmra.mxu1 %v141_v21 }
  0x9e   :  { %v138_v22 = vpop.f32.mrf.mxu0 }
 0x11a   :  { %v219_v32 = vpop.f32.mrf.mxu1 }
 0x11b   :  { %v220_v33 = vadd.f32 %v533_v31, %v219_v32 }
 0x11d   :  { %v223_v34 = vmax.f32 %v220_v33, 0.0 }
 0x11f   :  { %v224_v35 = vpack.c.bf16 %v223_v34, %v223_v34 }
 0x121   :  { %301 = vmatmul.bf16.vlgmr.msra.gmra.mxu2 %v224_v35 }
 0x122   :  { %v221_v36 = vpop.f32.mrf.mxu1 }
 0x1a4   :  { %v302_v40 = vpop.f32.mrf.mxu2 }
 0x1a5   :  { %v303_v41 = vadd.f32 %v534_v39, %v302_v40 }
 0x1a7   :  { %v306_v42 = vmax.f32 %v303_v41, 0.0 }
 0x1a9   :  { %v307_v43 = vpack.c.bf16 %v306_v42, %v306_v42 }
 0x1ab   :  { %384 = vmatmul.bf16.vlgmr.msra.gmra.mxu3 %v307_v43 }
 0x1ac   :  { %v304_v44 = vpop.f32.mrf.mxu2 }
 0x22e   :  { %v385_v46 = vpop.f32.mrf.mxu3 }
 0x22f   :  { %v386_v47 = vadd.f32 %v535_v45, %v385_v46 }
 0x231   :  { %v389_v48 = vmax.f32 %v386_v47, 0.0 }
 0x233   :  { %391 = vst.msk [vmem:[%s758_s9] sm:$0xff] %vm390_vm1, %v389_v48 }
 0x236   :  { %v387_v49 = vpop.f32.mrf.mxu3 }
 0x237   :  { %396 = vsyncpa [#allocation3], 1 }
 0x238   :  { %397 = vsyncpa [#allocation5], 1 }
 0x239   :  { %398 = vsyncpa [#allocation8], 1 }

</bundles_post_ra>
